<compile_context>
chip_gen: v7x
topology: tpu7x:2x2x1
jax: 0.10.0
libtpu: 0.0.40
codegen_flags: <defaults>
</compile_context>

<pallas_src>
import jax
import jax.numpy as jnp
from jax.experimental import pallas as pl
from jax.experimental.pallas import tpu as pltpu

LANES = 128
NUM_CORES = 2                       # leading "parallel" grid axis (v7x megacore)
TARGET_BLOCK_BYTES = 4 * 1024 * 1024  # ~4 MiB per input block (8 MiB double-buffered)


def _make_kernel(row_tile: int, acc_rows: int, valid_rows: int,
                 num_blocks: int, blocks_per_core: int, needs_mask: bool):
    """Builds the kernel with all sizes baked in statically."""
    last_block = num_blocks - 1

    def _fold(x):
        # (row_tile, 128) -> (acc_rows, 128) via elementwise max.  Pure VPU;
        # acc_rows/8 independent vreg chains keep the vmax dependence short.
        return x.reshape(-1, acc_rows, LANES).max(axis=0)

    def kernel(x_ref, o_ref):
        c = pl.program_id(0)          # core slice (parallel)
        i = pl.program_id(1)          # block within the core slice (arbitrary)
        # Clamped global block index: the surplus step of the second core (odd
        # num_blocks) re-reads the last block, which is harmless for a max.
        g = jnp.minimum(c * blocks_per_core + i, last_block)

        @pl.when(i == 0)
        def _init():
            o_ref[...] = jnp.full(o_ref.shape, -jnp.inf, o_ref.dtype)

        x = x_ref[...]                # (row_tile, LANES), native dtype

        if needs_mask:
            # Only the last block can contain rows past the end of the array.
            @pl.when(g != last_block)
            def _main():
                o_ref[...] = jnp.maximum(o_ref[...], _fold(x).astype(jnp.float32))

            @pl.when(g == last_block)
            def _tail():
                ridx = jax.lax.broadcasted_iota(jnp.int32, (row_tile, LANES), 0)
                global_row = g * row_tile + ridx
                xm = jnp.where(global_row < valid_rows,
                               x.astype(jnp.float32), -jnp.inf)
                o_ref[...] = jnp.maximum(o_ref[...], _fold(xm))
        else:
            o_ref[...] = jnp.maximum(o_ref[...], _fold(x).astype(jnp.float32))

    return kernel


def unary_max(a: jax.Array) -> jax.Array:
    """Computes max(a + a) over all elements; returns a 0-d array (same dtype)."""
    orig_dtype = a.dtype
    flat = a.reshape(-1)
    n = flat.shape[0]
    itemsize = jnp.dtype(orig_dtype).itemsize

    # Pad only to a multiple of LANES (128), and only when needed, using the
    # max-identity fill so the pad never has to be masked in-kernel.
    pad = (-n) % LANES
    if pad:
        if jnp.issubdtype(orig_dtype, jnp.floating):
            fill = float("-inf")
        else:
            fill = int(jnp.iinfo(orig_dtype).min)
        flat = jnp.pad(flat, (0, pad), constant_values=fill)
    rows = flat.shape[0] // LANES
    x2d = flat.reshape(rows, LANES)   # free bitcast when pad == 0

    # Fold granularity (accumulator rows) and block size.  row_tile is always
    # a multiple of acc_rows and never exceeds the array's row count.
    if rows >= 32:
        acc_rows = 32
    elif rows >= 8:
        acc_rows = 8
    else:
        acc_rows = rows               # block == full array dims (legal)
    max_row_tile = max(32, (TARGET_BLOCK_BYTES // (LANES * itemsize)) // 32 * 32)
    row_tile = min(max_row_tile, (rows // acc_rows) * acc_rows)

    num_blocks = pl.cdiv(rows, row_tile)
    blocks_per_core = pl.cdiv(num_blocks, NUM_CORES)
    needs_mask = (rows % row_tile) != 0

    kernel = _make_kernel(row_tile, acc_rows, rows, num_blocks,
                          blocks_per_core, needs_mask)

    partial = pl.pallas_call(
        kernel,
        out_shape=jax.ShapeDtypeStruct((NUM_CORES, acc_rows, LANES), jnp.float32),
        grid_spec=pltpu.PrefetchScalarGridSpec(
            num_scalar_prefetch=0,
            grid=(NUM_CORES, blocks_per_core),
            in_specs=[pl.BlockSpec(
                (row_tile, LANES),
                lambda c, i: (jnp.minimum(c * blocks_per_core + i,
                                          num_blocks - 1), 0))],
            out_specs=pl.BlockSpec((None, acc_rows, LANES),
                                   lambda c, i: (c, 0, 0)),
        ),
        compiler_params=pltpu.CompilerParams(
            # Core split is parallel; running-max over blocks is sequential.
            dimension_semantics=("parallel", "arbitrary")),
        cost_estimate=pl.CostEstimate(flops=n, transcendentals=0,
                                      bytes_accessed=n * itemsize),
    )(x2d)

    m = jnp.max(partial)              # tiny (2, acc_rows, 128) reduce in XLA
    if jnp.issubdtype(orig_dtype, jnp.floating):
        # max(a + a) == 2 * max(a), exact for floating point.
        return (2.0 * m).astype(orig_dtype)
    # TODO(synk): integer dtypes pass through f32 (precision loss above 2^24)
    # and 2*max(a) does not reproduce torch's wraparound of (a + a).
    return m.astype(orig_dtype) * 2


if __name__ == "__main__":
    key = jax.random.PRNGKey(0)
    # Small NCHW-like input consistent with the PyTorch module's test.
    x = jax.random.normal(key, (2, 4, 16, 16), dtype=jnp.float32)

    result = jax.block_until_ready(unary_max(x))

    # Reference check in plain JAX.
    ref = jnp.max(x + x)
    assert jnp.allclose(result, ref), (result, ref)
    print("KERNEL_OK")
</pallas_src>

<mosaic_0001>
module attributes {stable_mosaic.version = 11 : i64} {
  func.func @kernel(%arg0: i32, %arg1: i32, %arg2: memref<16x128xf32, #tpu.memory_space<vmem>>, %arg3: memref<1x8x128xf32, #tpu.memory_space<vmem>>) attributes {dimension_semantics = [#tpu.dimension_semantics<parallel>, #tpu.dimension_semantics<arbitrary>], iteration_bounds = array<i64: 2, 1>, scalar_prefetch = 0 : i64, scratch_operands = 0 : i64, tpu.core_type = #tpu.core_type<tc>, window_params = [{transform_indices = @transform_0, window_bounds = array<i64: 16, 128>}, {transform_indices = @transform_1, window_bounds = array<i64: 1, 8, 128>}]} {
    %c0_i32 = arith.constant 0 : i32
    %0 = arith.cmpi eq, %arg1, %c0_i32 : i32
    %1 = arith.extui %0 : i1 to i32
    %c0_i32_0 = arith.constant 0 : i32
    %2 = arith.cmpi ne, %1, %c0_i32_0 : i32
    scf.if %2 {
      %cst_8 = arith.constant 0xFF800000 : f32
      %12 = vector.broadcast %cst_8 : f32 to vector<8x128xf32>
      %c0_9 = arith.constant 0 : index
      %c0_10 = arith.constant 0 : index
      %c0_11 = arith.constant 0 : index
      %13 = vector.load %arg3[%c0_9, %c0_10, %c0_11] : memref<1x8x128xf32, #tpu.memory_space<vmem>>, vector<1x8x128xf32>
      %14 = vector.shape_cast %13 : vector<1x8x128xf32> to vector<8x128xf32>
      %15 = vector.shape_cast %12 : vector<8x128xf32> to vector<1x8x128xf32>
      tpu.vector_store %arg3[%c0_9, %c0_10, %c0_11], %15 {strides = array<i32>} : memref<1x8x128xf32, #tpu.memory_space<vmem>>, vector<1x8x128xf32>,
    } else {
    }
    %c0 = arith.constant 0 : index
    %c0_1 = arith.constant 0 : index
    %3 = vector.load %arg2[%c0, %c0_1] : memref<16x128xf32, #tpu.memory_space<vmem>>, vector<16x128xf32>
    %c0_2 = arith.constant 0 : index
    %c0_3 = arith.constant 0 : index
    %c0_4 = arith.constant 0 : index
    %4 = vector.load %arg3[%c0_2, %c0_3, %c0_4] : memref<1x8x128xf32, #tpu.memory_space<vmem>>, vector<1x8x128xf32>
    %5 = vector.shape_cast %4 : vector<1x8x128xf32> to vector<8x128xf32>
    %6 = vector.shape_cast %3 : vector<16x128xf32> to vector<2x8x128xf32>
    %cst = arith.constant dense<0xFF800000> : vector<8x128xf32>
    %7 = vector.multi_reduction <maximumf>, %6, %cst [0] : vector<2x8x128xf32> to vector<8x128xf32>
    %8 = arith.maximumf %5, %7 : vector<8x128xf32>
    %c0_5 = arith.constant 0 : index
    %c0_6 = arith.constant 0 : index
    %c0_7 = arith.constant 0 : index
    %9 = vector.load %arg3[%c0_5, %c0_6, %c0_7] : memref<1x8x128xf32, #tpu.memory_space<vmem>>, vector<1x8x128xf32>
    %10 = vector.shape_cast %9 : vector<1x8x128xf32> to vector<8x128xf32>
    %11 = vector.shape_cast %8 : vector<8x128xf32> to vector<1x8x128xf32>
    tpu.vector_store %arg3[%c0_5, %c0_6, %c0_7], %11 {strides = array<i32>} : memref<1x8x128xf32, #tpu.memory_space<vmem>>, vector<1x8x128xf32>,
    return
  }
  func.func @transform_0(%arg0: i32, %arg1: i32) -> (i32, i32) {
    %c1_i32 = arith.constant 1 : i32
    %0 = arith.muli %arg0, %c1_i32 : i32
    %1 = arith.addi %0, %arg1 : i32
    %c0_i32 = arith.constant 0 : i32
    %2 = arith.minsi %1, %c0_i32 : i32
    %c0_i32_0 = arith.constant 0 : i32
    %c0_i32_1 = arith.constant 0 : i32
    return %2, %c0_i32_0 : i32, i32
  }
  func.func @transform_1(%arg0: i32, %arg1: i32) -> (i32, i32, i32) {
    %c0_i32 = arith.constant 0 : i32
    %c0_i32_0 = arith.constant 0 : i32
    %c0_i32_1 = arith.constant 0 : i32
    return %arg0, %c0_i32, %c0_i32_0 : i32, i32, i32
  }
}

</mosaic_0001>

<bundles_post_ra>
// kernel: tpu_custom_call.1
= control target key start
LH: loop header
LB: loop body
LE: loop exit
PB: predicated region body
PF: predicated region fallthrough
CT: control target
= control target key end

     0   :  { %6 = vsyncpa [#allocation3], 0  ;;  %s677_s0 = inlined_call_operand.hbm [shape: f32[16,128], index: 0, kind: input, shape index: {}]   ;;  %s678_s1 = inlined_call_operand.hbm [shape: f32[2,8,128], index: 1, kind: output, shape index: {}]  }
   0x1   :  { %8 = vsyncpa [#allocation3 + $0x1], 0 }
   0x2   :  { %9 = vsyncpa [#allocation4], 0 }
   0x3   :  { %11 = vsyncpa [#allocation4 + $0x1], 0  ;;  %s516_s6 = smov 0   ;;  %s518_s7 = smov 0  }
   0x4   :  { %s520_s8 = smov 0   ;;  %s522_s9 = smov 0  }
   0x5   :  { %s524_s10 = smov 0   ;;  %s526_s11 = smov 0  }
   0x6   :  { %s528_s12 = smov 0   ;;  %s530_s13 = smov 0  }
   0x7 LB: > { %s263_s14 = sadd.s32 4294967295, %s500_s13   ;;  %s264_s15 = sadd.s32 4294967294, %s500_s13   ;;  %s500_s13 = sphi %s530_s13, %s17_s13   ;;  %s496_s12 = sphi %s528_s12, %s697_s12   ;;  %s492_s11 = sphi %s526_s11, %s696_s11   ;;  %s488_s10 = sphi %s524_s10, %s667_s10   ;;  %s484_s9 = sphi %s522_s9, %s695_s9   ;;  %s480_s8 = sphi %s520_s8, %s694_s8   ;;  %s476_s7 = sphi %s518_s7, %s693_s7   ;;  %s472_s6 = sphi %s516_s6, %s692_s6  }
   0x8   : > { %s29_s16 = sadd.s32 1, %s496_s12  ;;  %p469_p1 = scmp.ne.s32.totalorder %s488_s10, 0 }
   0x9   : > { %p31_p0 = scmp.ge.s32.totalorder %s29_s16, 2  ;;  %p50_p2 = scmp.eq.s32.totalorder %s500_s13, 0 }
   0xa   : > { %p55_p3 = scmp.ne.s32.totalorder %s488_s10, %s484_s9  ;;  %p56_p5 = scmp.eq.s32.totalorder %s263_s14, 0 }
   0xb   : > { %s699_s16 = smov (%p31_p0, %s29_s16), 0  ;;  %p562_p4 = por %p469_p1, %p50_p2 }
   0xc   : > { %p566_p6 = por %p56_p5, %p55_p3  ;;  %s65_s19 = ssub.s32 %s496_s12, %s699_s16 }
   0xd   : > { %p66_p7 = scmp.eq.s32.totalorder %s65_s19, 0  ;;  %s68_s20 = sadd.s32 1, %s480_s8 }
   0xe   : > { %s683_s18 = scalar_select %p566_p6, 1, 0 }
   0xf   : > { %s574_s21 = scalar_select %p66_p7, %s480_s8, %s68_s20  }
  0x10   : > { %p78_p8 = scmp.ne.s32.totalorder %s480_s8, %s476_s7  ;;  %p79_p9 = scmp.eq.s32.totalorder %s263_s14, 1 }
  0x11   : > { %p84_p10 = scmp.ne.s32.totalorder %s476_s7, %s472_s6  ;;  %p85_p11 = scmp.eq.s32.totalorder %s264_s15, 1 }
  0x12   : > { %p580_p12 = por %p79_p9, %p78_p8  ;;  %p290_p1 = scmp.lt.s32.totalorder %s500_s13, 2 }
  0x13   : > { %p585_p0 = por %p85_p11, %p84_p10  ;;  %s502_s24 = smov [#allocation2]  }
  0x14   : > { %s684_s22 = scalar_select %p580_p12, 1, 0 }
  0x15   : > { %s685_s23 = scalar_select %p585_p0, 1, 0 }
  0x16   : > { %s119_s25 = sshll.u32 %s502_s24, 4  ;;  %p592_p2 = pnand %p290_p1, %p562_p4  ;;  %s120_s25 = int_to_ptr.vmem [resolvable:$true] %s119_s25 }
  0x17   : > { %s367_s29 = scalar_lea.hbm %s677_s0, 256 }
  0x18   : > { %s686_s26 = scalar_select %p592_p2, 1, 0 }
  0x19   : > { %p368_p3 = scmp.ne.s32.totalorder %s677_s0, %s367_s29  ;;  %p369_p5 = pneg %p592_p2 }
  0x1a   : > { %p374_p9 = scmp.lt.u32.totalorder %s367_s29, %s367_s29  ;;  %p376_p4 = scmp.lt.u32.totalorder %s367_s29, %s677_s0 }
  0x1b   : > { %p370_p7 = pnand %p369_p5, %p368_p3 }
  0x1c   : > { %p377_p10 = por %p376_p4, %p374_p9 }
  0x1d   : > { %p371_p8 = pneg %p370_p7 }
  0x1f   : > { %p378_p11 = pnand %p377_p10, %p371_p8 }
  0x21   : > { %381 = shalt.err (!%p378_p11)
}
  0x22   : > { %s382_s5 = scalar_lea.vmem %s120_s25, 256  ;;  %s389_s9 = scalar_lea.vmem %s120_s25, 512 }
  0x23   : > { %p383_p1 = scmp.ne.s32.totalorder %s120_s25, %s382_s5  ;;  %p390_p12 = scmp.lt.s32.totalorder %s120_s25, %s120_s25 }
  0x24   : > { %p391_p6 = scmp.lt.s32.totalorder %s389_s9, %s382_s5 }
  0x25   : > { %p385_p13 = pnand %p383_p1, %p369_p5 }
  0x26   : > { %p392_p2 = por %p391_p6, %p390_p12 }
  0x27   : > { %p386_p0 = pneg %p385_p13 }
  0x29   : > { %p393_p3 = pnand %p392_p2, %p386_p0 }
  0x2b   : > { %396 = shalt.err (!%p393_p3)
}
  0x2c   : > { %s503_s14 = smov 128   ;;  %s504_s15 = smov 8  }
  0x2d   : > { %p687_p7 = scmp.ne.s32.totalorder %s686_s26, 0  ;;  %p270_p8 = scmp.ge.s32.totalorder %s500_s13, 1 }
  0x2e   : > { %p127_p9 = scmp.lt.s32.totalorder %s500_s13, 3 }
  0x2f   : > { %285 = dma.hbm_to_vmem [thread:$0]  (!%p687_p7), %s677_s0, 256, %s120_s25, [#allocation3], %s503_s14, %s503_s14, %s504_s15  }
  0x30   : > { %p128_p5 = pnand %p270_p8, %p127_p9 }
  0x31   : > { %s133_s20 = sand.u32 (!%p128_p5), 1, %s488_s10   ;;  %p688_p6 = scmp.ne.s32.totalorder (!%p128_p5), %s683_s18, 0 }
  0x32   : > { %131 = sbr.rel (%p128_p5) target bundleno = 84 (0x54), region = 24  ;;  %s271_s24 = sshll.u32 (!%p128_p5), %s133_s20, 4 }
  0x33   : > { %s134_s27 = scalar_lea.sflag (!%p128_p5), [#allocation3], %s133_s20  ;;  %s137_s28 = scalar_lea.vmem (!%p128_p5), [#allocation2], %s271_s24 }
  0x39   : > { %462 = dma.done.wait (%p688_p6), %s134_s27, 256  }
  0x3a   : > { %464 = vsyncadd (%p688_p6), %s134_s27, 4294967040  ;;  %s153_s26 = sand.u32 1, %s476_s7   ;;  %v165_v0 = vld [vmem:[%s137_s28] sm:$0xff]  ;;  %v166_v1 = vld [vmem:[%s137_s28 + $0x8] sm:$0xff]  ;;  %s274_s29 = sshll.u32 %s492_s11, 7 }
  0x3b   : > { %s272_s25 = sshll.u32 %s153_s26, 3  ;;  %v168_v2 = vmax.f32 %v165_v0, %v166_v1  ;;  %s624_s5 = scalar_lea.hbm %s678_s1, %s274_s29 }
  0x3c   : > { %s155_s30 = scalar_lea.vmem [#allocation5], %s272_s25  ;;  %s172_s18 = scalar_lea.sflag [#allocation4], %s153_s26 }
  0x3d   : > { %s185_s2 = sshll.u32 %s155_s30, 4  ;;  %170 = vst [vmem:[%s155_s30] sm:$0xff] %v168_v2  ;;  %p689_p13 = scmp.ne.s32.totalorder %s684_s22, 0  ;;  %s626_s2 = int_to_ptr.vmem [resolvable:$true] %s185_s2 }
  0x3e   : > { %s397_s9 = scalar_lea.vmem %s626_s2, 128  ;;  %s505_s11 = smov [#allocation5]  }
  0x3f   : > { %p398_p12 = scmp.ne.s32.totalorder %s626_s2, %s397_s9  ;;  %s401_s14 = sshll.u32 %s505_s11, 4  ;;  %s402_s14 = int_to_ptr.vmem [resolvable:$false] %s401_s14 }
  0x40   : > { %s403_s15 = scalar_lea.vmem %s402_s14, 256  ;;  %p404_p4 = scmp.lt.s32.totalorder %s626_s2, %s402_s14 }
  0x41   : > { %p399_p0 = pnand %p398_p12, %p689_p13  ;;  %p405_p10 = scmp.lt.s32.totalorder %s403_s15, %s397_s9 }
  0x43   : > { %p400_p2 = pneg %p399_p0  ;;  %p406_p11 = por %p405_p10, %p404_p4 }
  0x45   : > { %p407_p1 = pnand %p406_p11, %p400_p2 }
  0x47   : > { %410 = shalt.err (!%p407_p1)
}
  0x48   : > { %s411_s17 = scalar_lea.hbm %s624_s5, 128  ;;  %s415_s24 = scalar_lea.hbm %s678_s1, 256 }
  0x49   : > { %p412_p3 = scmp.ne.s32.totalorder %s624_s5, %s411_s17  ;;  %p416_p9 = scmp.lt.u32.totalorder %s624_s5, %s678_s1 }
  0x4a   : > { %p417_p5 = scmp.lt.u32.totalorder %s415_s24, %s411_s17  ;;  %p419_p12 = scmp.lt.u32.totalorder %s411_s17, %s624_s5 }
  0x4b   : > { %p413_p7 = pnand %p412_p3, %p689_p13 }
  0x4c   : > { %p418_p6 = por %p417_p5, %p416_p9 }
  0x4d   : > { %p414_p8 = pneg %p413_p7 }
  0x4e   : > { %p420_p0 = por %p419_p12, %p418_p6 }
  0x50   : > { %p421_p2 = pnand %p420_p0, %p414_p8 }
  0x52   : > { %424 = shalt.err (!%p421_p2)
}
  0x53   : > { %280 = dma.vmem_to_hbm [thread:$0]  (%p689_p13), %s626_s2, 128, %s624_s5, %s172_s18  }
  0x54 PF: > { %s197_s26 = sand.u32 1, %s472_s6   ;;  %p690_p4 = scmp.ne.s32.totalorder %s685_s23, 0 }
  0x55   : > { %p691_p10 = scmp.ge.s32.totalorder %s500_s13, 2  ;;  %s198_s25 = scalar_lea.sflag [#allocation4], %s197_s26 }
  0x57   : > { %p287_p11 = pnand %p691_p10, %p690_p4 }
  0x59   : > { %466 = dma.done.wait (!%p287_p11), %s198_s25, 128  }
  0x5a   : > { %468 = vsyncadd (!%p287_p11), %s198_s25, 4294967168  ;;  %s17_s13 = sadd.s32 1, %s500_s13   ;;  %s692_s6 = smov %s476_s7 }
  0x5b   : > { %p14_p1 = scmp.ge.s32.totalorder %s17_s13, 4   ;;  %s693_s7 = smov %s480_s8 }
  0x5c   : > { %s694_s8 = smov %s574_s21  ;;  %s695_s9 = smov %s488_s10 }
  0x5d   : > { %s667_s10 = smov 0   ;;  %s696_s11 = smov %s496_s12 }
  0x5e   : > { %s697_s12 = smov %s699_s16  ;;  %16 = sbr.rel (!%p14_p1) target bundleno = 7 (0x7), region = 73 }
  0x65   :  { %203 = vsyncpa [#allocation3], 1 }
  0x66   :  { %205 = vsyncpa [#allocation3 + $0x1], 1 }
  0x67   :  { %206 = vsyncpa [#allocation4], 1 }
  0x68   :  { %208 = vsyncpa [#allocation4 + $0x1], 1 }

</bundles_post_ra>
